<compile_context>
chip_gen: v6e
topology: v6e:2x2x1
jax: 0.10.0
libtpu: 0.0.40
codegen_flags: <defaults>
</compile_context>

<pallas_src>
import functools
import math

import jax
import jax.numpy as jnp
from jax.experimental import pallas as pl
from jax.experimental.pallas import tpu as pltpu


def _round_up(x, m):
    return ((x + m - 1) // m) * m


def _lstm_gates(gates, c0, H):
    """Shared elementwise LSTM cell math (f32). Gate order i, f, g, o (torch)."""
    i_g = jax.nn.sigmoid(gates[:, 0 * H:1 * H])
    f_g = jax.nn.sigmoid(gates[:, 1 * H:2 * H])
    g_g = jnp.tanh(gates[:, 2 * H:3 * H])
    o_g = jax.nn.sigmoid(gates[:, 3 * H:4 * H])
    c1 = f_g * c0 + i_g * g_g
    h1 = o_g * jnp.tanh(c1)
    return h1, c1


# --------------------------------------------------------------------------- #
# Kernels
# --------------------------------------------------------------------------- #
def _stacked_lstm_fused_kernel(x_ref, h0_ref, c0_ref, w_ref, b_ref,
                               h1_ref, c1_ref, *, H, D_slot, nb_layers):
    """All layers in ONE kernel invocation (no grid).

    The whole weight stack (L, K, G) is VMEM-resident and the layer loop is
    unrolled in Python, so there is exactly one launch and zero per-layer
    grid-step overhead (the dominant fixed cost at small H/L).

    x_ref  : (B, D_slot)       external input, weight dtype
    h0_ref : (L, B, H)         initial hidden, weight dtype
    c0_ref : (L, B, H)         initial cell, f32
    w_ref  : (L, K, G)         [W_ih^T ; W_hh^T] per layer, K = D_slot + H
    b_ref  : (L, 1, G)         b_ih + b_hh, f32
    h1_ref : (L, B, H)  out    f32
    c1_ref : (L, B, H)  out    f32
    """
    cur = x_ref[...]          # (B, D_slot)
    cur_w = D_slot
    for l in range(nb_layers):
        w_l = w_ref[l]        # (K, G)
        h0 = h0_ref[l]        # (B, H), weight dtype
        c0 = c0_ref[l].astype(jnp.float32)
        # Split matmul (no [x|h] concat needed): ih rows + hh rows.
        gates = (jnp.dot(cur, w_l[:cur_w, :], preferred_element_type=jnp.float32)
                 + jnp.dot(h0, w_l[D_slot:, :], preferred_element_type=jnp.float32)
                 + b_ref[l])
        h1, c1 = _lstm_gates(gates, c0, H)
        h1_ref[l, :, :] = h1.astype(h1_ref.dtype)
        c1_ref[l, :, :] = c1.astype(c1_ref.dtype)
        cur = h1.astype(cur.dtype)   # dropout == identity in eval mode
        cur_w = H


def _stacked_lstm_stream_kernel(x_ref, h0_ref, c0_ref, w_ref, b_ref,
                                h1_ref, c1_ref, xh_sc, *, H, D_slot):
    """One LSTM layer per grid step; grid axis 0 walks the layer stack.

    The next layer's weight block streams (double-buffered) while this layer
    computes; the inter-layer activation lives in the xh VMEM scratch so x/h
    never round-trip through HBM.

    xh_sc : (B, D_slot + H) VMEM scratch carrying [x | h], weight dtype.
    """
    layer = pl.program_id(0)

    @pl.when(layer == 0)
    def _():
        # Left slot holds the external input at layer 0.  For layers >= 1 only
        # its first H columns are consumed (weight rows [H:D_slot) are zero for
        # those layers), so NO per-layer tail re-zero is needed.
        xh_sc[:, :D_slot] = x_ref[...]

    xh_sc[:, D_slot:] = h0_ref[...]

    gates = jnp.dot(xh_sc[...], w_ref[...],
                    preferred_element_type=jnp.float32) + b_ref[...]
    c0 = c0_ref[...].astype(jnp.float32)
    h1, c1 = _lstm_gates(gates, c0, H)
    h1_ref[...] = h1.astype(h1_ref.dtype)
    c1_ref[...] = c1.astype(c1_ref.dtype)
    # Carry h1 as the next layer's input (dropout == identity in eval mode).
    xh_sc[:, :H] = h1.astype(xh_sc.dtype)


# --------------------------------------------------------------------------- #
# Parameters
# --------------------------------------------------------------------------- #
class StackedLSTMParams:
    """Mirrors torch.nn.LSTMCell init U(-1/sqrt(H), 1/sqrt(H)).

    Keeps raw per-layer f32 weights (reference path) plus tightly packed,
    pre-concatenated per-layer weight / bias stacks consumed by the kernels.
    Packing: per layer, W = [W_ih^T ; W_hh^T] of shape (K, G) with
      G = round_up(4*H, 128)          (total gate width only; no per-gate pad)
      D_slot = round_up(max(D_in, H), 8), K = D_slot + H.
    """

    def __init__(self, key, input_siz, rnn_siz, nb_layers,
                 param_dtype=jnp.bfloat16):
        self.nb_layers = nb_layers
        self.rnn_siz = rnn_siz
        self.input_siz = input_siz
        self.param_dtype = param_dtype

        H = rnn_siz
        self.G = _round_up(4 * H, 128)                  # packed gate lane width
        self.D_slot = _round_up(max(input_siz, H), 8)   # width of the [x] slot
        self.K = self.D_slot + H                        # rows of packed weight

        stdv = 1.0 / math.sqrt(H)
        self.layers = []          # raw (w_ih_t, w_hh_t, bias) per layer, f32
        w_stack, b_stack = [], []
        in_siz = input_siz
        for _ in range(nb_layers):
            key, k1, k2, k3, k4 = jax.random.split(key, 5)
            # torch stores weight_ih as (4H, D_in); we keep the transpose.
            w_ih_t = jax.random.uniform(k1, (in_siz, 4 * H), jnp.float32, -stdv, stdv)
            w_hh_t = jax.random.uniform(k2, (H, 4 * H), jnp.float32, -stdv, stdv)
            b_ih = jax.random.uniform(k3, (4 * H,), jnp.float32, -stdv, stdv)
            b_hh = jax.random.uniform(k4, (4 * H,), jnp.float32, -stdv, stdv)
            bias = b_ih + b_hh
            self.layers.append((w_ih_t, w_hh_t, bias))

            w_ih_p = jnp.pad(w_ih_t, ((0, self.D_slot - in_siz),
                                      (0, self.G - 4 * H)))
            w_hh_p = jnp.pad(w_hh_t, ((0, 0), (0, self.G - 4 * H)))
            w_stack.append(jnp.concatenate([w_ih_p, w_hh_p], axis=0))
            b_stack.append(jnp.pad(bias, (0, self.G - 4 * H)).reshape(1, self.G))
            in_siz = H

        # (L, K, G) weights in param_dtype (bf16 default); (L, 1, G) bias f32.
        self.w_packed = jnp.stack(w_stack).astype(param_dtype)
        self.b_packed = jnp.stack(b_stack).astype(jnp.float32)

    def get_init_hx(self, batch_size):
        h0 = [jnp.zeros((batch_size, self.rnn_siz), jnp.float32)
              for _ in range(self.nb_layers)]
        c0 = [jnp.zeros((batch_size, self.rnn_siz), jnp.float32)
              for _ in range(self.nb_layers)]
        return h0, c0


# --------------------------------------------------------------------------- #
# Forward wrapper
# --------------------------------------------------------------------------- #
def stacked_lstm_forward(params, inp, hidden, *, force_stream=False):
    """Matches StackedLSTM.forward: returns (output, (h_1, c_1)) with h_1, c_1
    stacked along a leading nb_layers axis."""
    h_0, c_0 = hidden
    B, D_in = inp.shape
    H = params.rnn_siz
    L = params.nb_layers
    G, K, D_slot = params.G, params.K, params.D_slot
    wdt = params.param_dtype
    B_pad = _round_up(B, 8)
    itemsize = jnp.dtype(wdt).itemsize

    x_p = jnp.zeros((B_pad, D_slot), wdt).at[:B, :D_in].set(inp.astype(wdt))
    h0_p = jnp.zeros((L, B_pad, H), wdt).at[:, :B, :].set(
        jnp.stack(h_0).astype(wdt))
    c0_p = jnp.zeros((L, B_pad, H), jnp.float32).at[:, :B, :].set(jnp.stack(c_0))

    w_bytes = L * K * G * itemsize
    act_bytes = (B_pad * D_slot * itemsize
                 + 2 * L * B_pad * H * (itemsize + 4)   # h0/c0 in, h1/c1 out
                 + L * G * 4)                           # bias

    out_shapes = (jax.ShapeDtypeStruct((L, B_pad, H), jnp.float32),
                  jax.ShapeDtypeStruct((L, B_pad, H), jnp.float32))

    use_fused = (not force_stream) and (w_bytes + act_bytes) < (8 << 20)

    if use_fused:
        # Whole weight stack resident in VMEM: single launch, no grid.
        vmem_limit = int(min(max(2 * (w_bytes + act_bytes) + (4 << 20),
                                 16 << 20), 64 << 20))
        kernel = functools.partial(_stacked_lstm_fused_kernel,
                                   H=H, D_slot=D_slot, nb_layers=L)
        h1_p, c1_p = pl.pallas_call(
            kernel,
            out_shape=out_shapes,
            compiler_params=pltpu.CompilerParams(vmem_limit_bytes=vmem_limit),
        )(x_p, h0_p, c0_p, params.w_packed, params.b_packed)
    else:
        # Layer-streaming path: one layer's weights per grid step,
        # double-buffered; layer axis is a true dependence chain -> arbitrary.
        vmem_limit = int(min(max(2 * K * G * itemsize + (8 << 20), 16 << 20),
                             64 << 20))
        state_spec = pl.BlockSpec((None, B_pad, H), lambda l: (l, 0, 0))
        kernel = functools.partial(_stacked_lstm_stream_kernel,
                                   H=H, D_slot=D_slot)
        h1_p, c1_p = pl.pallas_call(
            kernel,
            out_shape=out_shapes,
            grid_spec=pltpu.PrefetchScalarGridSpec(
                num_scalar_prefetch=0,
                grid=(L,),
                in_specs=[
                    pl.BlockSpec((B_pad, D_slot), lambda l: (0, 0)),          # x
                    state_spec,                                               # h0
                    state_spec,                                               # c0
                    pl.BlockSpec((None, K, G), lambda l: (l, 0, 0)),          # W
                    pl.BlockSpec((None, 1, G), lambda l: (l, 0, 0)),          # b
                ],
                out_specs=(state_spec, state_spec),
                scratch_shapes=[pltpu.VMEM((B_pad, K), wdt)],
            ),
            compiler_params=pltpu.CompilerParams(
                dimension_semantics=("arbitrary",),
                vmem_limit_bytes=vmem_limit),
        )(x_p, h0_p, c0_p, params.w_packed, params.b_packed)

    h_1 = h1_p[:, :B, :]
    c_1 = c1_p[:, :B, :]
    out = h_1[-1]   # dropout == identity in eval mode
    return out, (h_1, c_1)


# --------------------------------------------------------------------------- #
# Test
# --------------------------------------------------------------------------- #
if __name__ == "__main__":
    key = jax.random.PRNGKey(0)
    key, k_param, k_inp, k_h, k_c = jax.random.split(key, 5)

    batch = 8
    input_siz = 32
    rnn_siz = 32
    nb_layers = 2

    x = jax.random.normal(k_inp, (batch, input_siz), jnp.float32)
    # Non-zero initial state to exercise the h @ W_hh path.
    h_0 = list(jax.random.normal(k_h, (nb_layers, batch, rnn_siz), jnp.float32))
    c_0 = list(jax.random.normal(k_c, (nb_layers, batch, rnn_siz), jnp.float32))
    hidden = (h_0, c_0)

    params_f32 = StackedLSTMParams(k_param, input_siz, rnn_siz, nb_layers,
                                   param_dtype=jnp.float32)
    params_bf16 = StackedLSTMParams(k_param, input_siz, rnn_siz, nb_layers)  # default bf16

    # Pure-JAX reference of the stacked LSTMCell math (f32).
    def ref_forward(x, hidden):
        h_0, c_0 = hidden
        outs_h, outs_c = [], []
        cur = x
        H = rnn_siz
        for i, (w_ih_t, w_hh_t, bias) in enumerate(params_f32.layers):
            gates = cur @ w_ih_t + h_0[i] @ w_hh_t + bias
            i_g = jax.nn.sigmoid(gates[:, 0:H])
            f_g = jax.nn.sigmoid(gates[:, H:2 * H])
            g_g = jnp.tanh(gates[:, 2 * H:3 * H])
            o_g = jax.nn.sigmoid(gates[:, 3 * H:4 * H])
            c1 = f_g * c_0[i] + i_g * g_g
            h1 = o_g * jnp.tanh(c1)
            cur = h1
            outs_h.append(h1)
            outs_c.append(c1)
        return cur, (jnp.stack(outs_h), jnp.stack(outs_c))

    ref_out, (ref_h, ref_c) = ref_forward(x, hidden)

    # f32 weights: fused (no grid) and streamed (grid over layers) paths.
    for force_stream in (False, True):
        out, (h_1, c_1) = stacked_lstm_forward(params_f32, x, hidden,
                                               force_stream=force_stream)
        jax.block_until_ready((out, h_1, c_1))
        assert out.shape == (batch, rnn_siz)
        assert h_1.shape == (nb_layers, batch, rnn_siz)
        assert c_1.shape == (nb_layers, batch, rnn_siz)
        assert jnp.allclose(out, ref_out, atol=1e-5)
        assert jnp.allclose(h_1, ref_h, atol=1e-5)
        assert jnp.allclose(c_1, ref_c, atol=1e-5)

    # bf16 weights (default): f32 MXU accumulation + f32 gate math.
    for force_stream in (False, True):
        out_b, (h_b, c_b) = stacked_lstm_forward(params_bf16, x, hidden,
                                                 force_stream=force_stream)
        jax.block_until_ready((out_b, h_b, c_b))
        assert jnp.allclose(out_b, ref_out, atol=5e-2)
        assert jnp.allclose(h_b, ref_h, atol=5e-2)
        assert jnp.allclose(c_b, ref_c, atol=5e-2)

    print("KERNEL_OK")
</pallas_src>

<mosaic_0001>
module attributes {stable_mosaic.version = 11 : i64} {
  func.func @_stacked_lstm_fused_kernel(%arg0: memref<8x32xf32, #tpu.memory_space<vmem>>, %arg1: memref<2x8x32xf32, #tpu.memory_space<vmem>>, %arg2: memref<2x8x32xf32, #tpu.memory_space<vmem>>, %arg3: memref<2x64x128xf32, #tpu.memory_space<vmem>>, %arg4: memref<2x1x128xf32, #tpu.memory_space<vmem>>, %arg5: memref<2x8x32xf32, #tpu.memory_space<vmem>>, %arg6: memref<2x8x32xf32, #tpu.memory_space<vmem>>) attributes {dimension_semantics = [], scalar_prefetch = 0 : i64, scratch_operands = 0 : i64, tpu.core_type = #tpu.core_type<tc>} {
    %c0 = arith.constant 0 : index
    %c0_0 = arith.constant 0 : index
    %0 = vector.load %arg0[%c0, %c0_0] : memref<8x32xf32, #tpu.memory_space<vmem>>, vector<8x32xf32>
    %c0_1 = arith.constant 0 : index
    %c0_2 = arith.constant 0 : index
    %c0_3 = arith.constant 0 : index
    %1 = vector.load %arg3[%c0_1, %c0_2, %c0_3] : memref<2x64x128xf32, #tpu.memory_space<vmem>>, vector<1x64x128xf32>
    %2 = vector.shape_cast %1 : vector<1x64x128xf32> to vector<64x128xf32>
    %c0_4 = arith.constant 0 : index
    %c0_5 = arith.constant 0 : index
    %c0_6 = arith.constant 0 : index
    %3 = vector.load %arg1[%c0_4, %c0_5, %c0_6] : memref<2x8x32xf32, #tpu.memory_space<vmem>>, vector<1x8x32xf32>
    %4 = vector.shape_cast %3 : vector<1x8x32xf32> to vector<8x32xf32>
    %c0_7 = arith.constant 0 : index
    %c0_8 = arith.constant 0 : index
    %c0_9 = arith.constant 0 : index
    %5 = vector.load %arg2[%c0_7, %c0_8, %c0_9] : memref<2x8x32xf32, #tpu.memory_space<vmem>>, vector<1x8x32xf32>
    %6 = vector.shape_cast %5 : vector<1x8x32xf32> to vector<8x32xf32>
    %7 = vector.extract_strided_slice %2 {offsets = [0, 0], sizes = [32, 128], strides = [1, 1]} : vector<64x128xf32> to vector<32x128xf32>
    %cst = arith.constant dense<0.000000e+00> : vector<8x128xf32>
    %8 = tpu.matmul %0, %7, %cst {dimension_numbers = #tpu.dot_dimension_numbers<[1], [0], [0], [1], [0, 0, 1, 1], [], []>} : vector<8x32xf32>, vector<32x128xf32>, vector<8x128xf32> -> vector<8x128xf32>
    %9 = vector.extract_strided_slice %2 {offsets = [32, 0], sizes = [32, 128], strides = [1, 1]} : vector<64x128xf32> to vector<32x128xf32>
    %cst_10 = arith.constant dense<0.000000e+00> : vector<8x128xf32>
    %10 = tpu.matmul %4, %9, %cst_10 {dimension_numbers = #tpu.dot_dimension_numbers<[1], [0], [0], [1], [0, 0, 1, 1], [], []>} : vector<8x32xf32>, vector<32x128xf32>, vector<8x128xf32> -> vector<8x128xf32>
    %11 = arith.addf %8, %10 : vector<8x128xf32>
    %c0_11 = arith.constant 0 : index
    %c0_12 = arith.constant 0 : index
    %c0_13 = arith.constant 0 : index
    %12 = vector.load %arg4[%c0_11, %c0_12, %c0_13] : memref<2x1x128xf32, #tpu.memory_space<vmem>>, vector<1x1x128xf32>
    %13 = vector.shape_cast %12 : vector<1x1x128xf32> to vector<1x128xf32>
    %14 = vector.broadcast %13 : vector<1x128xf32> to vector<8x128xf32>
    %15 = arith.addf %11, %14 : vector<8x128xf32>
    %16 = vector.extract_strided_slice %15 {offsets = [0, 0], sizes = [8, 32], strides = [1, 1]} : vector<8x128xf32> to vector<8x32xf32>
    %17 = arith.negf %16 : vector<8x32xf32>
    %18 = math.exp %17 : vector<8x32xf32>
    %cst_14 = arith.constant 1.000000e+00 : f32
    %19 = vector.broadcast %cst_14 : f32 to vector<8x32xf32>
    %20 = arith.addf %19, %18 : vector<8x32xf32>
    %21 = arith.divf %19, %20 : vector<8x32xf32>
    %22 = vector.extract_strided_slice %15 {offsets = [0, 32], sizes = [8, 32], strides = [1, 1]} : vector<8x128xf32> to vector<8x32xf32>
    %23 = arith.negf %22 : vector<8x32xf32>
    %24 = math.exp %23 : vector<8x32xf32>
    %cst_15 = arith.constant 1.000000e+00 : f32
    %25 = vector.broadcast %cst_15 : f32 to vector<8x32xf32>
    %26 = arith.addf %25, %24 : vector<8x32xf32>
    %27 = arith.divf %25, %26 : vector<8x32xf32>
    %28 = vector.extract_strided_slice %15 {offsets = [0, 64], sizes = [8, 32], strides = [1, 1]} : vector<8x128xf32> to vector<8x32xf32>
    %29 = math.tanh %28 : vector<8x32xf32>
    %30 = vector.extract_strided_slice %15 {offsets = [0, 96], sizes = [8, 32], strides = [1, 1]} : vector<8x128xf32> to vector<8x32xf32>
    %31 = arith.negf %30 : vector<8x32xf32>
    %32 = math.exp %31 : vector<8x32xf32>
    %cst_16 = arith.constant 1.000000e+00 : f32
    %33 = vector.broadcast %cst_16 : f32 to vector<8x32xf32>
    %34 = arith.addf %33, %32 : vector<8x32xf32>
    %35 = arith.divf %33, %34 : vector<8x32xf32>
    %36 = arith.mulf %27, %6 : vector<8x32xf32>
    %37 = arith.mulf %21, %29 : vector<8x32xf32>
    %38 = arith.addf %36, %37 : vector<8x32xf32>
    %39 = math.tanh %38 : vector<8x32xf32>
    %40 = arith.mulf %35, %39 : vector<8x32xf32>
    %c0_17 = arith.constant 0 : index
    %c0_18 = arith.constant 0 : index
    %c0_19 = arith.constant 0 : index
    %41 = vector.load %arg5[%c0_17, %c0_18, %c0_19] : memref<2x8x32xf32, #tpu.memory_space<vmem>>, vector<1x8x32xf32>
    %42 = vector.shape_cast %41 : vector<1x8x32xf32> to vector<8x32xf32>
    %43 = vector.shape_cast %40 : vector<8x32xf32> to vector<1x8x32xf32>
    tpu.vector_store %arg5[%c0_17, %c0_18, %c0_19], %43 {strides = array<i32>} : memref<2x8x32xf32, #tpu.memory_space<vmem>>, vector<1x8x32xf32>,
    %c0_20 = arith.constant 0 : index
    %c0_21 = arith.constant 0 : index
    %c0_22 = arith.constant 0 : index
    %44 = vector.load %arg6[%c0_20, %c0_21, %c0_22] : memref<2x8x32xf32, #tpu.memory_space<vmem>>, vector<1x8x32xf32>
    %45 = vector.shape_cast %44 : vector<1x8x32xf32> to vector<8x32xf32>
    %46 = vector.shape_cast %38 : vector<8x32xf32> to vector<1x8x32xf32>
    tpu.vector_store %arg6[%c0_20, %c0_21, %c0_22], %46 {strides = array<i32>} : memref<2x8x32xf32, #tpu.memory_space<vmem>>, vector<1x8x32xf32>,
    %c1 = arith.constant 1 : index
    %c0_23 = arith.constant 0 : index
    %c0_24 = arith.constant 0 : index
    %47 = vector.load %arg3[%c1, %c0_23, %c0_24] : memref<2x64x128xf32, #tpu.memory_space<vmem>>, vector<1x64x128xf32>
    %48 = vector.shape_cast %47 : vector<1x64x128xf32> to vector<64x128xf32>
    %c1_25 = arith.constant 1 : index
    %c0_26 = arith.constant 0 : index
    %c0_27 = arith.constant 0 : index
    %49 = vector.load %arg1[%c1_25, %c0_26, %c0_27] : memref<2x8x32xf32, #tpu.memory_space<vmem>>, vector<1x8x32xf32>
    %50 = vector.shape_cast %49 : vector<1x8x32xf32> to vector<8x32xf32>
    %c1_28 = arith.constant 1 : index
    %c0_29 = arith.constant 0 : index
    %c0_30 = arith.constant 0 : index
    %51 = vector.load %arg2[%c1_28, %c0_29, %c0_30] : memref<2x8x32xf32, #tpu.memory_space<vmem>>, vector<1x8x32xf32>
    %52 = vector.shape_cast %51 : vector<1x8x32xf32> to vector<8x32xf32>
    %53 = vector.extract_strided_slice %48 {offsets = [0, 0], sizes = [32, 128], strides = [1, 1]} : vector<64x128xf32> to vector<32x128xf32>
    %cst_31 = arith.constant dense<0.000000e+00> : vector<8x128xf32>
    %54 = tpu.matmul %40, %53, %cst_31 {dimension_numbers = #tpu.dot_dimension_numbers<[1], [0], [0], [1], [0, 0, 1, 1], [], []>} : vector<8x32xf32>, vector<32x128xf32>, vector<8x128xf32> -> vector<8x128xf32>
    %55 = vector.extract_strided_slice %48 {offsets = [32, 0], sizes = [32, 128], strides = [1, 1]} : vector<64x128xf32> to vector<32x128xf32>
    %cst_32 = arith.constant dense<0.000000e+00> : vector<8x128xf32>
    %56 = tpu.matmul %50, %55, %cst_32 {dimension_numbers = #tpu.dot_dimension_numbers<[1], [0], [0], [1], [0, 0, 1, 1], [], []>} : vector<8x32xf32>, vector<32x128xf32>, vector<8x128xf32> -> vector<8x128xf32>
    %57 = arith.addf %54, %56 : vector<8x128xf32>
    %c1_33 = arith.constant 1 : index
    %c0_34 = arith.constant 0 : index
    %c0_35 = arith.constant 0 : index
    %58 = vector.load %arg4[%c1_33, %c0_34, %c0_35] : memref<2x1x128xf32, #tpu.memory_space<vmem>>, vector<1x1x128xf32>
    %59 = vector.shape_cast %58 : vector<1x1x128xf32> to vector<1x128xf32>
    %60 = vector.broadcast %59 : vector<1x128xf32> to vector<8x128xf32>
    %61 = arith.addf %57, %60 : vector<8x128xf32>
    %62 = vector.extract_strided_slice %61 {offsets = [0, 0], sizes = [8, 32], strides = [1, 1]} : vector<8x128xf32> to vector<8x32xf32>
    %63 = arith.negf %62 : vector<8x32xf32>
    %64 = math.exp %63 : vector<8x32xf32>
    %cst_36 = arith.constant 1.000000e+00 : f32
    %65 = vector.broadcast %cst_36 : f32 to vector<8x32xf32>
    %66 = arith.addf %65, %64 : vector<8x32xf32>
    %67 = arith.divf %65, %66 : vector<8x32xf32>
    %68 = vector.extract_strided_slice %61 {offsets = [0, 32], sizes = [8, 32], strides = [1, 1]} : vector<8x128xf32> to vector<8x32xf32>
    %69 = arith.negf %68 : vector<8x32xf32>
    %70 = math.exp %69 : vector<8x32xf32>
    %cst_37 = arith.constant 1.000000e+00 : f32
    %71 = vector.broadcast %cst_37 : f32 to vector<8x32xf32>
    %72 = arith.addf %71, %70 : vector<8x32xf32>
    %73 = arith.divf %71, %72 : vector<8x32xf32>
    %74 = vector.extract_strided_slice %61 {offsets = [0, 64], sizes = [8, 32], strides = [1, 1]} : vector<8x128xf32> to vector<8x32xf32>
    %75 = math.tanh %74 : vector<8x32xf32>
    %76 = vector.extract_strided_slice %61 {offsets = [0, 96], sizes = [8, 32], strides = [1, 1]} : vector<8x128xf32> to vector<8x32xf32>
    %77 = arith.negf %76 : vector<8x32xf32>
    %78 = math.exp %77 : vector<8x32xf32>
    %cst_38 = arith.constant 1.000000e+00 : f32
    %79 = vector.broadcast %cst_38 : f32 to vector<8x32xf32>
    %80 = arith.addf %79, %78 : vector<8x32xf32>
    %81 = arith.divf %79, %80 : vector<8x32xf32>
    %82 = arith.mulf %73, %52 : vector<8x32xf32>
    %83 = arith.mulf %67, %75 : vector<8x32xf32>
    %84 = arith.addf %82, %83 : vector<8x32xf32>
    %85 = math.tanh %84 : vector<8x32xf32>
    %86 = arith.mulf %81, %85 : vector<8x32xf32>
    %c1_39 = arith.constant 1 : index
    %c0_40 = arith.constant 0 : index
    %c0_41 = arith.constant 0 : index
    %87 = vector.load %arg5[%c1_39, %c0_40, %c0_41] : memref<2x8x32xf32, #tpu.memory_space<vmem>>, vector<1x8x32xf32>
    %88 = vector.shape_cast %87 : vector<1x8x32xf32> to vector<8x32xf32>
    %89 = vector.shape_cast %86 : vector<8x32xf32> to vector<1x8x32xf32>
    tpu.vector_store %arg5[%c1_39, %c0_40, %c0_41], %89 {strides = array<i32>} : memref<2x8x32xf32, #tpu.memory_space<vmem>>, vector<1x8x32xf32>,
    %c1_42 = arith.constant 1 : index
    %c0_43 = arith.constant 0 : index
    %c0_44 = arith.constant 0 : index
    %90 = vector.load %arg6[%c1_42, %c0_43, %c0_44] : memref<2x8x32xf32, #tpu.memory_space<vmem>>, vector<1x8x32xf32>
    %91 = vector.shape_cast %90 : vector<1x8x32xf32> to vector<8x32xf32>
    %92 = vector.shape_cast %84 : vector<8x32xf32> to vector<1x8x32xf32>
    tpu.vector_store %arg6[%c1_42, %c0_43, %c0_44], %92 {strides = array<i32>} : memref<2x8x32xf32, #tpu.memory_space<vmem>>, vector<1x8x32xf32>,
    return
  }
}

</mosaic_0001>

<bundles_post_ra>
// kernel: tpu_custom_call.1
= control target key start
LH: loop header
LB: loop body
LE: loop exit
PB: predicated region body
PF: predicated region fallthrough
CT: control target
= control target key end

     0   :  { %12 = vsyncpa [#allocation3], 0  ;;  %s884_s0 = inlined_call_operand.hbm [shape: f32[8,32], index: 0, kind: input, shape index: {}]   ;;  %s885_s1 = inlined_call_operand.hbm [shape: f32[2,8,32], index: 1, kind: input, shape index: {}]   ;;  %s886_s2 = inlined_call_operand.hbm [shape: f32[2,8,32], index: 2, kind: input, shape index: {}]   ;;  %s887_s3 = inlined_call_operand.hbm [shape: f32[2,64,128], index: 3, kind: input, shape index: {}]   ;;  %s888_s4 = inlined_call_operand.vmem [shape: f32[2,1,128], index: 4, kind: input, shape index: {}]   ;;  %s889_s5 = inlined_call_operand.hbm [shape: f32[2,8,32], index: 5, kind: output, shape index: {0}]   ;;  %s890_s6 = inlined_call_operand.hbm [shape: f32[2,8,32], index: 6, kind: output, shape index: {1}]  }
   0x1   :  { %13 = vsyncpa [#allocation6], 0 }
   0x2   :  { %14 = vsyncpa [#allocation9], 0 }
   0x3   :  { %15 = vsyncpa [#allocation4], 0 }
   0x4   :  { %16 = vsyncpa [#allocation12], 0  ;;  %s755_s21 = smov [#allocation5]  }
   0x5   :  { %s32_s22 = sshll.u32 %s755_s21, 4  ;;  %s33_s22 = int_to_ptr.vmem [resolvable:$true] %s32_s22 }
   0x6   :  { %s633_s23 = scalar_lea.vmem %s33_s22, 256  ;;  %p638_p1 = scmp.lt.s32.totalorder %s33_s22, %s33_s22 }
   0x7   :  { %p634_p0 = scmp.ne.s32.totalorder %s33_s22, %s633_s23  ;;  %p639_p2 = scmp.lt.s32.totalorder %s633_s23, %s633_s23 }
   0x9   :  { %p640_p3 = por %p639_p2, %p638_p1 }
   0xb   :  { %p641_p4 = pnand %p640_p3, %p634_p0 }
   0xd   :  { %644 = shalt.err (!%p641_p4)
}
   0xe   :  { %s756_s24 = smov 128   ;;  %s757_s25 = smov 8  }
   0xf   :  { %38 = dma.hbm_to_vmem [thread:$0]  %s885_s1, 256, %s33_s22, [#allocation6], %s756_s24, %s756_s24, %s757_s25  }
  0x10   :  { %s758_s28 = smov [#allocation2]   ;;  %s759_s30 = smov [#allocation7]  }
  0x11   :  { %s23_s29 = sshll.u32 %s758_s28, 4  ;;  %s44_s7 = sshll.u32 %s759_s30, 4  ;;  %s24_s29 = int_to_ptr.vmem [resolvable:$true] %s23_s29  ;;  %s45_s7 = int_to_ptr.vmem [resolvable:$true] %s44_s7 }
  0x12   :  { %s653_s8 = scalar_lea.vmem %s24_s29, 128  ;;  %p658_p6 = scmp.lt.s32.totalorder %s24_s29, %s24_s29 }
  0x13   :  { %p654_p5 = scmp.ne.s32.totalorder %s24_s29, %s653_s8  ;;  %p659_p7 = scmp.lt.s32.totalorder %s653_s8, %s653_s8 }
  0x15   :  { %p660_p8 = por %p659_p7, %p658_p6 }
  0x17   :  { %p661_p9 = pnand %p660_p8, %p654_p5 }
  0x19   :  { %664 = shalt.err (!%p661_p9)
}
  0x1a   :  { %26 = dma.hbm_to_vmem [thread:$0]  %s884_s0, 128, %s24_s29, [#allocation3]  }
  0x1b   :  { %s673_s11 = scalar_lea.vmem %s45_s7, 256  ;;  %p678_p11 = scmp.lt.s32.totalorder %s45_s7, %s45_s7 }
  0x1c   :  { %p674_p10 = scmp.ne.s32.totalorder %s45_s7, %s673_s11  ;;  %p679_p12 = scmp.lt.s32.totalorder %s673_s11, %s673_s11 }
  0x1e   :  { %p680_p13 = por %p679_p12, %p678_p11 }
  0x20   :  { %p681_p0 = pnand %p680_p13, %p674_p10 }
  0x22   :  { %684 = shalt.err (!%p681_p0)
}
  0x23   :  { %50 = dma.hbm_to_vmem [thread:$0]  %s886_s2, 256, %s45_s7, [#allocation6], %s756_s24, %s756_s24, %s757_s25  }
  0x24   :  { %s760_s13 = smov [#allocation8]  }
  0x25   :  { %s56_s14 = sshll.u32 %s760_s13, 4  ;;  %s57_s14 = int_to_ptr.vmem [resolvable:$true] %s56_s14 }
  0x26   :  { %s693_s15 = scalar_lea.vmem %s57_s14, 2048  ;;  %p698_p2 = scmp.lt.s32.totalorder %s57_s14, %s57_s14 }
  0x27   :  { %p694_p1 = scmp.ne.s32.totalorder %s57_s14, %s693_s15  ;;  %p699_p3 = scmp.lt.s32.totalorder %s693_s15, %s693_s15 }
  0x29   :  { %p700_p4 = por %p699_p3, %p698_p2 }
  0x2b   :  { %p701_p5 = pnand %p700_p4, %p694_p1 }
  0x2d   :  { %704 = shalt.err (!%p701_p5)
}
  0x2e   :  { %62 = dma.hbm_to_vmem [thread:$0]  %s887_s3, 2048, %s57_s14, [#allocation9], %s756_s24, %s756_s24, %s757_s25  }
  0x2f   :  { %745 = dma.done.wait [#allocation3], 128  }
  0x30   :  { %746 = vsyncadd [#allocation3], 4294967168 }
  0x31   :  { %747 = dma.done.wait [#allocation6], 512  }
  0x32   :  { %748 = vsyncadd [#allocation6], 4294966784 }
  0x33   :  { %749 = dma.done.wait [#allocation9], 2048  }
  0x34   :  { %750 = vsyncadd [#allocation9], 4294965248  ;;  %v761_v0 = vmov 0.0   ;;  %vm762_vm0 = vmmov 0   ;;  %v85_v1 = vld [vmem:[#allocation8 + $0x38] sm:$0xff]  ;;  %v84_v3 = vld [vmem:[#allocation8 + $0x30] sm:$0xff] }
  0x35   :  { %552 = vmatprep.subr.mxu0 %v761_v0  ;;  %563 = vmatprep.subr.mxu1 %v761_v0  ;;  %v81_v2 = vld [vmem:[#allocation8 + $0x18] sm:$0xff]  ;;  %v80_v4 = vld [vmem:[#allocation8 + $0x10] sm:$0xff]  ;;  %v83_v5 = vld [vmem:[#allocation8 + $0x28] sm:$0xff]  ;;  %vm88_vm1 = vcmask 261120   ;;  %s763_s17 = smov 64   ;;  %s764_s18 = smov 32  }
  0x36   :  { %560 = vmatprep.mubr.msk.f32.mxu0 %vm762_vm0, %v761_v0  ;;  %571 = vmatprep.mubr.msk.f32.mxu1 %vm762_vm0, %v761_v0  ;;  %v79_v6 = vld [vmem:[#allocation8 + $0x8] sm:$0xff]  ;;  %v82_v7 = vld [vmem:[#allocation8 + $0x20] sm:$0xff]  ;;  %v77_v10 = vld [vmem:[#allocation2] sm:$0xff]  ;;  %s765_s21 = smov 96  }
  0x37   :  { %553 = vmatpush3.msra.mxu0 %v85_v1  ;;  %564 = vmatpush3.msra.mxu1 %v81_v2  ;;  %v78_v8 = vld [vmem:[#allocation8] sm:$0xff]  ;;  %v525_v13 = vld [vmem:[%s888_s4] ss:$0 sm:$0xff]  ;;  %v87_v19 = vld [vmem:[#allocation7] sm:$0xff] }
  0x38   :  { %554 = vmatprep.subr.mxu0 %v761_v0  ;;  %565 = vmatprep.subr.mxu1 %v761_v0  ;;  %v86_v9 = vld [vmem:[#allocation5] sm:$0xff]  ;;  %v289_v30 = vld [vmem:[#allocation8 + $0x78] sm:$0xff]  ;;  %v288_v31 = vld [vmem:[#allocation8 + $0x70] sm:$0xff] }
  0x39   :  { %555 = vmatpush3.msra.mxu0 %v84_v3  ;;  %566 = vmatpush3.msra.mxu1 %v80_v4  ;;  %v285_v32 = vld [vmem:[#allocation8 + $0x58] sm:$0xff]  ;;  %v284_v33 = vld [vmem:[#allocation8 + $0x50] sm:$0xff]  ;;  %v287_v34 = vld [vmem:[#allocation8 + $0x68] sm:$0xff] }
  0x3a   :  { %556 = vmatprep.subr.mxu0 %v761_v0  ;;  %567 = vmatprep.subr.mxu1 %v761_v0  ;;  %v283_v35 = vld [vmem:[#allocation8 + $0x48] sm:$0xff]  ;;  %v286_v36 = vld [vmem:[#allocation8 + $0x60] sm:$0xff]  ;;  %v293_v42 = vld [vmem:[#allocation7 + $0x8] sm:$0xff] }
  0x3b   :  { %557 = vmatpush3.msra.mxu0 %v83_v5  ;;  %568 = vmatpush3.msra.mxu1 %v79_v6  ;;  %v282_v37 = vld [vmem:[#allocation8 + $0x40] sm:$0xff]  ;;  %v291_v38 = vld [vmem:[#allocation5 + $0x8] sm:$0xff]  ;;  %v530_v47 = vld [vmem:[%s888_s4 + $0x1] ss:$0 sm:$0xff]  ;;  %s766_s4 = smov [#allocation11]  }
  0x3c   :  { %558 = vmatprep.subr.mxu0 %v761_v0  ;;  %569 = vmatprep.subr.mxu1 %v761_v0  ;;  %s505_s22 = sshll.u32 %s766_s4, 4  ;;  %s506_s22 = int_to_ptr.vmem [resolvable:$true] %s505_s22 }
  0x3d   :  { %559 = vmatpush3.msra.mxu0 %v82_v7  ;;  %570 = vmatpush3.msra.mxu1 %v78_v8  ;;  %s705_s23 = scalar_lea.vmem %s506_s22, 256  ;;  %p710_p7 = scmp.lt.s32.totalorder %s506_s22, %s506_s22 }
  0x3e   :  { %561 = vmatmul.mubr.msk.f32.vlgmr.msra.gmra.mxu0 %vm88_vm1, %v86_v9  ;;  %572 = vmatmul.mubr.msk.f32.vlgmr.msra.gmra.mxu1 %vm88_vm1, %v77_v10  ;;  %p706_p6 = scmp.ne.s32.totalorder %s506_s22, %s705_s23  ;;  %p711_p8 = scmp.lt.s32.totalorder %s705_s23, %s705_s23 }
  0x3f   :  { %574 = vmatprep.subr.mxu0 %v761_v0  ;;  %585 = vmatprep.subr.mxu1 %v761_v0 }
  0x40   :  { %582 = vmatprep.mubr.msk.f32.mxu0 %vm762_vm0, %v761_v0  ;;  %593 = vmatprep.mubr.msk.f32.mxu1 %vm762_vm0, %v761_v0  ;;  %p712_p9 = por %p711_p8, %p710_p7 }
  0x41   :  { %575 = vmatpush3.msra.mxu0 %v289_v30  ;;  %586 = vmatpush3.msra.mxu1 %v285_v32 }
  0x42   :  { %576 = vmatprep.subr.mxu0 %v761_v0  ;;  %587 = vmatprep.subr.mxu1 %v761_v0  ;;  %p713_p10 = pnand %p712_p9, %p706_p6 }
  0x43   :  { %577 = vmatpush3.msra.mxu0 %v288_v31  ;;  %588 = vmatpush3.msra.mxu1 %v284_v33 }
  0x44   :  { %578 = vmatprep.subr.mxu0 %v761_v0  ;;  %589 = vmatprep.subr.mxu1 %v761_v0 }
  0x45   :  { %579 = vmatpush3.msra.mxu0 %v287_v34  ;;  %590 = vmatpush3.msra.mxu1 %v283_v35 }
  0x46   :  { %580 = vmatprep.subr.mxu0 %v761_v0  ;;  %591 = vmatprep.subr.mxu1 %v761_v0 }
  0x47   :  { %581 = vmatpush3.msra.mxu0 %v286_v36  ;;  %592 = vmatpush3.msra.mxu1 %v282_v37 }
  0x48   :  { %583 = vmatmul.mubr.msk.f32.vlgmr.msra.gmra.mxu0 %vm88_vm1, %v291_v38 }
  0xfe   :  { %v158_v11 = vpop.f32.mrf.mxu0  ;;  %v231_v12 = vpop.f32.mrf.mxu1 }
  0xff   :  { %v232_v14 = vadd.f32 %v231_v12, %v158_v11 }
 0x100   :  { %v562_v15 = vpop.f32.mrf.mxu0  ;;  %v573_v16 = vpop.f32.mrf.mxu1 }
 0x101   :  { %v242_v17 = vadd.f32 %v525_v13, %v232_v14 }
 0x103   :  { %609 = vtanh.f32 %v242_v17  ;;  %v526_v20 = vmul.f32 -1.442695, %v242_v17 }
 0x105   :  { %611 = vpow2.f32 %v526_v20 }
 0x108   :  { %v363_v43 = vpop.f32.mrf.mxu0 }
 0x10a   :  { %v584_v44 = vpop.f32.mrf.mxu0 }
 0x110   :  { %v610_v18 = vpop.eup %609 }
 0x111   :  { %256 = vrot.lane.b32.xlu0 %v610_v18, %s763_s17 }
 0x112   :  { %v612_v21 = vpop.eup %611 }
 0x113   :  { %v246_v22 = vadd.f32 1.0, %v612_v21 }
 0x115   :  { %251 = vrot.lane.b32.xlu0 %v87_v19, %s764_s18  ;;  %613 = vrcp.f32 %v246_v22 }
 0x122   :  { %v614_v23 = vpop.eup %613 }
 0x183   :  { %v257_v24 = vpop.permute.xlu0 %256 }
 0x184   :  { %v259_v25 = vmul.f32 %v614_v23, %v257_v24 }
 0x186   :  { %261 = vrot.lane.b32.xlu1 %v259_v25, %s764_s18 }
 0x187   :  { %v252_v26 = vpop.permute.xlu0 %251 }
 0x188   :  { %v254_v27 = vmul.f32 %v614_v23, %v252_v26 }
 0x1f8   :  { %v262_v28 = vpop.permute.xlu1 %261 }
 0x1f9   :  { %v264_v29 = vadd.f32 %v262_v28, %v254_v27 }
 0x1fb   :  { %615 = vtanh.f32 %v264_v29 }
 0x208   :  { %v616_v39 = vpop.eup %615 }
 0x209   :  { %267 = vrot.lane.b32.xlu1 %v616_v39, %s763_s17 }
 0x27b   :  { %v268_v40 = vpop.permute.xlu1 %267 }
 0x27c   :  { %v270_v41 = vmul.f32 %v614_v23, %v268_v40 }
 0x27e   :  { %272 = vrot.lane.b32.xlu0 %v270_v41, %s764_s18 }
 0x282   :  { %456 = vrot.lane.b32.xlu0 %v293_v42, %s764_s18 }
 0x2f0   :  { %v273_v45 = vpop.permute.xlu0 %272 }
 0x2f1   :  { %275 = vst.msk [vmem:[#allocation10] sm:$0xff] %vm88_vm1, %v273_v45  ;;  %594 = vmatmul.mubr.msk.f32.vlgmr.msra.gmra.mxu1 %vm88_vm1, %v273_v45 }
 0x2f4   :  { %v457_v58 = vpop.permute.xlu0 %456 }
 0x3b1   :  { %v435_v46 = vpop.f32.mrf.mxu1 }
 0x3b2   :  { %v436_v48 = vadd.f32 %v435_v46, %v363_v43 }
 0x3b3   :  { %v595_v49 = vpop.f32.mrf.mxu1 }
 0x3b4   :  { %v447_v50 = vadd.f32 %v530_v47, %v436_v48 }
 0x3b6   :  { %617 = vtanh.f32 %v447_v50  ;;  %v531_v52 = vmul.f32 -1.442695, %v447_v50 }
 0x3b8   :  { %619 = vpow2.f32 %v531_v52 }
 0x3c3   :  { %v618_v51 = vpop.eup %617 }
 0x3c4   :  { %461 = vrot.lane.b32.xlu1 %v618_v51, %s763_s17 }
 0x3c5   :  { %v620_v53 = vpop.eup %619 }
 0x3c6   :  { %v451_v54 = vadd.f32 1.0, %v620_v53 }
 0x3c8   :  { %621 = vrcp.f32 %v451_v54 }
 0x3d5   :  { %v622_v55 = vpop.eup %621 }
 0x3d6   :  { %v459_v59 = vmul.f32 %v622_v55, %v457_v58 }
 0x436   :  { %v462_v56 = vpop.permute.xlu1 %461 }
 0x437   :  { %v464_v57 = vmul.f32 %v622_v55, %v462_v56 }
 0x439   :  { %466 = vrot.lane.b32.xlu1 %v464_v57, %s764_s18 }
 0x43d   :  { %277 = vrot.lane.b32.xlu1 %v264_v29, %s765_s21 }
 0x4ab   :  { %v467_v60 = vpop.permute.xlu1 %466 }
 0x4ac   :  { %v469_v61 = vadd.f32 %v467_v60, %v459_v59 }
 0x4ae   :  { %623 = vtanh.f32 %v469_v61  ;;  %483 = vrot.lane.b32.xlu1 %v469_v61, %s765_s21 }
 0x4af   :  { %v278_v62 = vpop.permute.xlu1 %277 }
 0x4b0   :  { %280 = vst.msk [vmem:[#allocation11] sm:$0xff] %vm88_vm1, %v278_v62 }
 0x4bb   :  { %v624_v63 = vpop.eup %623 }
 0x4bc   :  { %472 = vrot.lane.b32.xlu0 %v624_v63, %s763_s17 }
 0x520   :  { %v484_v0 = vpop.permute.xlu1 %483 }
 0x521   :  { %487 = vst.msk [vmem:[#allocation11 + $0x8] sm:$0xff] %vm88_vm1, %v484_v0 }
 0x522   :  { %716 = shalt.err (!%p713_p10)
}
 0x523   :  { %511 = dma.vmem_to_hbm [thread:$0]  %s506_s22, 256, %s890_s6, [#allocation12], %s756_s24, %s756_s24, %s757_s25  }
 0x524   :  { %s767_s28 = smov [#allocation10]  }
 0x525   :  { %s493_s29 = sshll.u32 %s767_s28, 4  ;;  %s494_s29 = int_to_ptr.vmem [resolvable:$true] %s493_s29 }
 0x526   :  { %s725_s30 = scalar_lea.vmem %s494_s29, 256  ;;  %p730_p12 = scmp.lt.s32.totalorder %s494_s29, %s494_s29 }
 0x527   :  { %p726_p11 = scmp.ne.s32.totalorder %s494_s29, %s725_s30  ;;  %p731_p13 = scmp.lt.s32.totalorder %s725_s30, %s725_s30 }
 0x529   :  { %p732_p0 = por %p731_p13, %p730_p12 }
 0x52b   :  { %p733_p1 = pnand %p732_p0, %p726_p11 }
 0x52e   :  { %v473_v1 = vpop.permute.xlu0 %472 }
 0x52f   :  { %v475_v2 = vmul.f32 %v622_v55, %v473_v1 }
 0x531   :  { %477 = vrot.lane.b32.xlu0 %v475_v2, %s764_s18 }
 0x5a3   :  { %v478_v3 = vpop.permute.xlu0 %477 }
 0x5a4   :  { %481 = vst.msk [vmem:[#allocation10 + $0x8] sm:$0xff] %vm88_vm1, %v478_v3 }
 0x5a5   :  { %736 = shalt.err (!%p733_p1)
}
 0x5a6   :  { %499 = dma.vmem_to_hbm [thread:$0]  %s494_s29, 256, %s889_s5, [#allocation4], %s756_s24, %s756_s24, %s757_s25  }
 0x5a7   :  { %751 = dma.done.wait [#allocation4], 256  }
 0x5a8   :  { %752 = vsyncadd [#allocation4], 4294967040 }
 0x5a9   :  { %753 = dma.done.wait [#allocation12], 256  }
 0x5aa   :  { %754 = vsyncadd [#allocation12], 4294967040 }
 0x5ab   :  { %518 = vsyncpa [#allocation3], 1 }
 0x5ac   :  { %519 = vsyncpa [#allocation6], 1 }
 0x5ad   :  { %520 = vsyncpa [#allocation9], 1 }
 0x5ae   :  { %521 = vsyncpa [#allocation4], 1 }
 0x5af   :  { %522 = vsyncpa [#allocation12], 1 }

</bundles_post_ra>
